<compile_context>
chip_gen: v7x
topology: tpu7x:2x2x1
jax: 0.10.0
libtpu: 0.0.40
codegen_flags: <defaults>
</compile_context>

<pallas_src>
import jax
import jax.numpy as jnp
from jax.experimental import pallas as pl
from jax.experimental.pallas import tpu as pltpu


def _round_up(x, m):
    return ((x + m - 1) // m) * m


def _pick_tile(dim, candidates):
    """Largest candidate tile that evenly divides `dim` (dim is a multiple of 128)."""
    for c in candidates:
        if c <= dim and dim % c == 0:
            return c
    return dim


def _vmem_cap_bytes():
    """Generation-aware VMEM ceiling (~3/4 of physical per-core VMEM)."""
    try:
        phys = int(getattr(pltpu.get_tpu_info(), "vmem_capacity_bytes"))
    except Exception:
        phys = 64 * 1024 * 1024  # conservative default = v7x per-TC VMEM
    return (phys * 3) // 4       # ~48 MiB on v7x, ~96 MiB on v5e/v6e


_RESIDENT_W_BUDGET = 8 * 1024 * 1024  # keep the full fused W in VMEM when this small


# ---------------------------------------------------------------------------
# Kernels
# ---------------------------------------------------------------------------
def _linear_resident_kernel(x_ref, w_ref, b_ref, o_ref):
    # x_ref: (tm, K), w_ref: (K, N) VMEM-resident, b_ref: (1, N) f32, o_ref: (tm, N)
    # Single K step -> no accumulator scratch / extra VMEM store+reload.
    x = x_ref[...].astype(w_ref.dtype)  # in-kernel cast (VPU has slack in a DMA-bound kernel)
    acc = jnp.dot(x, w_ref[...], preferred_element_type=jnp.float32)
    o_ref[...] = (acc + b_ref[...]).astype(o_ref.dtype)


def _linear_tiled_kernel(x_ref, w_ref, b_ref, o_ref, acc_ref):
    # Fallback path for very large W: grid=(M,N,K), f32 accumulator, reduction axis last.
    k = pl.program_id(2)

    @pl.when(k == 0)
    def _():
        acc_ref[...] = jnp.zeros_like(acc_ref)

    acc_ref[...] += jnp.dot(x_ref[...].astype(w_ref.dtype), w_ref[...],
                            preferred_element_type=jnp.float32)

    @pl.when(k == pl.num_programs(2) - 1)
    def _():
        o_ref[...] = (acc_ref[...] + b_ref[...]).astype(o_ref.dtype)


# ---------------------------------------------------------------------------
# Wrapper
# ---------------------------------------------------------------------------
def pallas_linear(x2d, w, b, *, out_dtype=None, tm=1024):
    """out = x2d @ w + b  (f32 MXU accumulation, bias added in the f32 epilogue).

    x2d: (M, K) any float dtype; cast to w.dtype inside the kernel (no wrapper HBM pass)
    w  : (K, N) already transposed vs torch's (N, K); may be pre-cast to bf16
    b  : (N,)
    """
    M, K = x2d.shape
    Kw, N = w.shape
    assert K == Kw and b.shape == (N,)
    out_dtype = jnp.dtype(out_dtype if out_dtype is not None else x2d.dtype)
    b2 = b.astype(jnp.float32).reshape(1, N)

    x_bytes = x2d.dtype.itemsize
    w_bytes = w.dtype.itemsize
    o_bytes = out_dtype.itemsize
    # sub-32-bit dtypes pack rows along sublanes -> coarser row alignment for the M tile
    row_align = {4: 8, 2: 16, 1: 32}[min(x_bytes, o_bytes)]
    vmem_cap = _vmem_cap_bytes()

    # ---- row-tile selection: never pad or slice x / out along M ----
    if M <= row_align:
        tm_eff = M  # full-dim block (exception to the 8-row divisibility rule)
    else:
        tm_eff = min(_round_up(tm, row_align), _round_up(M, row_align))
        if tm_eff >= M:
            # split into >=2 blocks so both v7x TensorCores engage on the parallel axis
            tm_eff = _round_up(pl.cdiv(M, 2), row_align)

    resident = (K * N * w_bytes) <= _RESIDENT_W_BUDGET

    if resident:
        # ---- fast path: W + bias resident in VMEM, 1-D grid over M, no accumulator ----
        def vmem_need(t):
            return (2 * t * K * x_bytes + 2 * t * N * o_bytes
                    + 2 * K * N * w_bytes + 2 * N * 4)

        while tm_eff > row_align and vmem_need(tm_eff) > vmem_cap:
            tm_eff = max(row_align, _round_up(tm_eff // 2, row_align))

        grid_m = pl.cdiv(M, tm_eff)
        cost = pl.CostEstimate(
            flops=2 * M * K * N,
            transcendentals=0,
            bytes_accessed=M * K * x_bytes + K * N * w_bytes + N * 4 + M * N * o_bytes,
        )
        return pl.pallas_call(
            _linear_resident_kernel,
            out_shape=jax.ShapeDtypeStruct((M, N), out_dtype),
            grid_spec=pltpu.PrefetchScalarGridSpec(
                num_scalar_prefetch=0,
                grid=(grid_m,),
                in_specs=[
                    pl.BlockSpec((tm_eff, K), lambda i: (i, 0)),
                    pl.BlockSpec((K, N), lambda i: (0, 0)),   # constant index -> W DMA'd once
                    pl.BlockSpec((1, N), lambda i: (0, 0)),
                ],
                out_specs=pl.BlockSpec((tm_eff, N), lambda i: (i, 0)),
            ),
            compiler_params=pltpu.CompilerParams(
                dimension_semantics=("parallel",),
                vmem_limit_bytes=int(min(max(2 * vmem_need(tm_eff), 16 << 20), vmem_cap)),
            ),
            cost_estimate=cost,
        )(x2d, w, b2)

    # ---- fallback: W too large for residency -> streamed tiles + f32 accumulator ----
    # K MUST be zero-padded (garbage in the reduction axis would corrupt the sum);
    # this path only triggers for very large pd, where the one-time pad is amortized.
    K_pad = _round_up(K, 128)
    N_pad = _round_up(N, 128)
    x_p = jnp.pad(x2d, ((0, 0), (0, K_pad - K))) if K_pad != K else x2d
    w_p = jnp.pad(w, ((0, K_pad - K), (0, N_pad - N))) if (K_pad, N_pad) != (K, N) else w
    b_p = jnp.pad(b2, ((0, 0), (0, N_pad - N))) if N_pad != N else b2

    tk = _pick_tile(K_pad, (2048, 1024, 512, 256, 128))
    tn = _pick_tile(N_pad, (1024, 512, 256, 128))

    def vmem_need(t):
        return (2 * t * tk * x_bytes + 2 * tk * tn * w_bytes
                + 2 * t * tn * o_bytes + t * tn * 4 + 2 * tn * 4)

    while tm_eff > row_align and vmem_need(tm_eff) > vmem_cap:
        tm_eff = max(row_align, _round_up(tm_eff // 2, row_align))

    grid = (pl.cdiv(M, tm_eff), N_pad // tn, K_pad // tk)
    cost = pl.CostEstimate(
        flops=2 * M * K_pad * N_pad,
        transcendentals=0,
        bytes_accessed=(M * K_pad * x_bytes + grid[0] * K_pad * N_pad * w_bytes
                        + N_pad * 4 + M * N_pad * o_bytes),
    )
    out = pl.pallas_call(
        _linear_tiled_kernel,
        out_shape=jax.ShapeDtypeStruct((M, N_pad), out_dtype),
        grid_spec=pltpu.PrefetchScalarGridSpec(
            num_scalar_prefetch=0,
            grid=grid,
            in_specs=[
                pl.BlockSpec((tm_eff, tk), lambda i, j, k: (i, k)),
                pl.BlockSpec((tk, tn), lambda i, j, k: (k, j)),
                pl.BlockSpec((1, tn), lambda i, j, k: (0, j)),
            ],
            out_specs=pl.BlockSpec((tm_eff, tn), lambda i, j, k: (i, j)),
            scratch_shapes=[pltpu.VMEM((tm_eff, tn), jnp.float32)],
        ),
        compiler_params=pltpu.CompilerParams(
            dimension_semantics=("parallel", "parallel", "arbitrary"),
            vmem_limit_bytes=int(min(max(2 * vmem_need(tm_eff), 16 << 20), vmem_cap)),
        ),
        cost_estimate=cost,
    )(x_p, w_p, b_p)
    return out[:, :N] if N_pad != N else out


# ---------------------------------------------------------------------------
# Module-level parameter fusion + forward
# ---------------------------------------------------------------------------
def prepare_params(params, *, d_spect, patch_size, compute_dtype=None):
    """Fold Linear(p*d->p*d) -> reshape -> Linear(d->d) into one (pd, pd) affine map.

    Exactly equivalent in eval mode (dropout = identity):
      W_fused[:, pi*d:(pi+1)*d] = W1[:, pi*d:(pi+1)*d] @ W2
      b_fused[pi*d:(pi+1)*d]    = b1[pi*d:(pi+1)*d]    @ W2 + b2
    compute_dtype (e.g. jnp.bfloat16) casts the fused weight ONCE here (amortized across
    calls); x is cast to that dtype inside the kernel, bias stays f32.  Recommended on
    v5e as well as v6e/v7x (kernel is HBM-bound; epilogue remains f32).  Note the fused
    bf16 weight differs slightly (numerically) from running two bf16 matmuls.
    """
    pd = patch_size * d_spect
    hp = jax.lax.Precision.HIGHEST
    w1, b1, w2, b2 = params["w1"], params["b1"], params["w2"], params["b2"]
    w_fused = jnp.einsum("kpd,de->kpe",
                         w1.reshape(pd, patch_size, d_spect), w2,
                         precision=hp).reshape(pd, pd)
    b_fused = (jnp.dot(b1.reshape(patch_size, d_spect), w2, precision=hp)
               + b2[None, :]).reshape(pd)
    if compute_dtype is not None:
        w_fused = w_fused.astype(compute_dtype)
    return {"w": w_fused, "b": b_fused.astype(jnp.float32)}


def unvision_forward(x, fused_params, *, d_spect, patch_size, out_dtype=None, tm=1024):
    """x: (b, s, patch_size*d_spect) -> (b, s*patch_size, d_spect). Eval mode."""
    bsz, seq, pd = x.shape
    assert pd == patch_size * d_spect
    # TODO(synk): dropout / dropout2 omitted (eval-mode identity). Training-mode dropout
    # between the two linears would invalidate the weight fusion; the second matmul would
    # then have to run as a per-patch epilogue inside the kernel instead.
    x2d = x.reshape(bsz * seq, pd)
    z = pallas_linear(x2d, fused_params["w"], fused_params["b"],
                      out_dtype=out_dtype if out_dtype is not None else x.dtype, tm=tm)
    return z.reshape(bsz, seq * patch_size, d_spect)


def init_params(key, d_spect, patch_size):
    pd = d_spect * patch_size
    k1, k2, k3, k4 = jax.random.split(key, 4)
    lim1 = 1.0 / jnp.sqrt(pd)
    lim2 = 1.0 / jnp.sqrt(d_spect)
    return {
        # stored as (in, out) = torch_weight.T
        "w1": jax.random.uniform(k1, (pd, pd), jnp.float32, -lim1, lim1),
        "b1": jax.random.uniform(k2, (pd,), jnp.float32, -lim1, lim1),
        "w2": jax.random.uniform(k3, (d_spect, d_spect), jnp.float32, -lim2, lim2),
        "b2": jax.random.uniform(k4, (d_spect,), jnp.float32, -lim2, lim2),
    }


if __name__ == "__main__":
    d_spect = 32
    patch_size = 4
    batch = 2
    seq = 8

    key = jax.random.PRNGKey(0)
    kx, kp = jax.random.split(key)
    x = jax.random.normal(kx, (batch, seq, patch_size * d_spect), jnp.float32)
    params = init_params(kp, d_spect, patch_size)

    # Reference: plain JAX, unfused two-linear path (same math as the torch module, eval).
    hp = jax.lax.Precision.HIGHEST
    ref = jnp.dot(x.reshape(batch * seq, -1), params["w1"], precision=hp) + params["b1"]
    ref = ref.reshape(batch, seq, patch_size, d_spect).reshape(-1, d_spect)
    ref = jnp.dot(ref, params["w2"], precision=hp) + params["b2"]
    ref = ref.reshape(batch, seq * patch_size, d_spect)

    # f32 weight path.
    fused_f32 = prepare_params(params, d_spect=d_spect, patch_size=patch_size)
    out_f32 = unvision_forward(x, fused_f32, d_spect=d_spect, patch_size=patch_size)
    out_f32 = jax.block_until_ready(out_f32)
    assert out_f32.shape == (batch, seq * patch_size, d_spect)
    assert jnp.allclose(out_f32, ref, atol=1e-2, rtol=1e-2)

    # bf16 weight path (in-kernel x cast, f32 accumulation) — recommended on v5e/v6e/v7x.
    fused_bf16 = prepare_params(params, d_spect=d_spect, patch_size=patch_size,
                                compute_dtype=jnp.bfloat16)
    out_bf16 = unvision_forward(x, fused_bf16, d_spect=d_spect, patch_size=patch_size)
    out_bf16 = jax.block_until_ready(out_bf16)
    assert out_bf16.shape == (batch, seq * patch_size, d_spect)
    assert jnp.allclose(out_bf16, ref, atol=5e-2, rtol=5e-2)

    # bf16 output path (halves output write traffic if the consumer tolerates it).
    out_lo = unvision_forward(x, fused_bf16, d_spect=d_spect, patch_size=patch_size,
                              out_dtype=jnp.bfloat16)
    out_lo = jax.block_until_ready(out_lo)
    assert out_lo.shape == (batch, seq * patch_size, d_spect)
    assert out_lo.dtype == jnp.bfloat16
    assert jnp.allclose(out_lo.astype(jnp.float32), ref, atol=1e-1, rtol=1e-1)

    print("KERNEL_OK")
</pallas_src>

<mosaic_0001>
module attributes {stable_mosaic.version = 11 : i64} {
  func.func @_linear_resident_kernel(%arg0: i32, %arg1: memref<8x128xf32, #tpu.memory_space<vmem>>, %arg2: memref<128x128xf32, #tpu.memory_space<vmem>>, %arg3: memref<1x128xf32, #tpu.memory_space<vmem>>, %arg4: memref<8x128xf32, #tpu.memory_space<vmem>>) attributes {dimension_semantics = [#tpu.dimension_semantics<parallel>], iteration_bounds = array<i64: 2>, scalar_prefetch = 0 : i64, scratch_operands = 0 : i64, tpu.core_type = #tpu.core_type<tc>, window_params = [{transform_indices = @transform_0, window_bounds = array<i64: 8, 128>}, {pipeline_mode = #tpu.pipeline_mode<synchronous>, transform_indices = @transform_1, window_bounds = array<i64: 128, 128>}, {pipeline_mode = #tpu.pipeline_mode<synchronous>, transform_indices = @transform_2, window_bounds = array<i64: 1, 128>}, {transform_indices = @transform_3, window_bounds = array<i64: 8, 128>}]} {
    %c0 = arith.constant 0 : index
    %c0_0 = arith.constant 0 : index
    %0 = vector.load %arg1[%c0, %c0_0] : memref<8x128xf32, #tpu.memory_space<vmem>>, vector<8x128xf32>
    %c0_1 = arith.constant 0 : index
    %c0_2 = arith.constant 0 : index
    %1 = vector.load %arg2[%c0_1, %c0_2] : memref<128x128xf32, #tpu.memory_space<vmem>>, vector<128x128xf32>
    %cst = arith.constant dense<0.000000e+00> : vector<8x128xf32>
    %2 = tpu.matmul %0, %1, %cst {dimension_numbers = #tpu.dot_dimension_numbers<[1], [0], [0], [1], [0, 0, 1, 1], [], []>} : vector<8x128xf32>, vector<128x128xf32>, vector<8x128xf32> -> vector<8x128xf32>
    %c0_3 = arith.constant 0 : index
    %c0_4 = arith.constant 0 : index
    %3 = vector.load %arg3[%c0_3, %c0_4] : memref<1x128xf32, #tpu.memory_space<vmem>>, vector<1x128xf32>
    %4 = vector.broadcast %3 : vector<1x128xf32> to vector<8x128xf32>
    %5 = arith.addf %2, %4 : vector<8x128xf32>
    %c0_5 = arith.constant 0 : index
    %c0_6 = arith.constant 0 : index
    %6 = vector.load %arg4[%c0_5, %c0_6] : memref<8x128xf32, #tpu.memory_space<vmem>>, vector<8x128xf32>
    tpu.vector_store %arg4[%c0_5, %c0_6], %5 {strides = array<i32>} : memref<8x128xf32, #tpu.memory_space<vmem>>, vector<8x128xf32>,
    return
  }
  func.func @transform_0(%arg0: i32) -> (i32, i32) {
    %c0_i32 = arith.constant 0 : i32
    %c0_i32_0 = arith.constant 0 : i32
    return %arg0, %c0_i32 : i32, i32
  }
  func.func @transform_1(%arg0: i32) -> (i32, i32) {
    %c0_i32 = arith.constant 0 : i32
    %c0_i32_0 = arith.constant 0 : i32
    %c0_i32_1 = arith.constant 0 : i32
    return %c0_i32, %c0_i32_0 : i32, i32
  }
  func.func @transform_2(%arg0: i32) -> (i32, i32) {
    %c0_i32 = arith.constant 0 : i32
    %c0_i32_0 = arith.constant 0 : i32
    %c0_i32_1 = arith.constant 0 : i32
    return %c0_i32, %c0_i32_0 : i32, i32
  }
  func.func @transform_3(%arg0: i32) -> (i32, i32) {
    %c0_i32 = arith.constant 0 : i32
    %c0_i32_0 = arith.constant 0 : i32
    return %arg0, %c0_i32 : i32, i32
  }
}

</mosaic_0001>

<bundles_post_ra>
// kernel: tpu_custom_call.1
= control target key start
LH: loop header
LB: loop body
LE: loop exit
PB: predicated region body
PF: predicated region fallthrough
CT: control target
= control target key end

     0   :  { %8 = vsyncpa [#allocation3], 0  ;;  %s907_s0 = inlined_call_operand.hbm [shape: f32[16,128], index: 0, kind: input, shape index: {}]   ;;  %s908_s1 = inlined_call_operand.hbm [shape: f32[128,128], index: 1, kind: input, shape index: {}]   ;;  %s909_s2 = inlined_call_operand.vmem [shape: f32[1,128], index: 2, kind: input, shape index: {}]   ;;  %s910_s3 = inlined_call_operand.hbm [shape: f32[16,128], index: 3, kind: output, shape index: {}]  }
   0x1   :  { %10 = vsyncpa [#allocation3 + $0x1], 0 }
   0x2   :  { %11 = vsyncpa [#allocation6], 0 }
   0x3   :  { %12 = vsyncpa [#allocation4], 0 }
   0x4   :  { %14 = vsyncpa [#allocation4 + $0x1], 0  ;;  %s701_s12 = smov 0   ;;  %s703_s13 = smov 0  }
   0x5   :  { %s705_s14 = smov 0   ;;  %s707_s15 = smov 0  }
   0x6 LB: > { %s722_s16 = sadd.s32 4294967295, %s671_s15   ;;  %s390_s17 = sadd.s32 4294967294, %s671_s15   ;;  %s671_s15 = sphi %s707_s15, %s930_s15   ;;  %s667_s14 = sphi %s705_s14, %s929_s14   ;;  %s663_s13 = sphi %s703_s13, %s928_s13   ;;  %s659_s12 = sphi %s701_s12, %s927_s12  }
   0x7   : > { %p40_p0 = scmp.ne.s32.totalorder %s663_s13, %s659_s12  ;;  %p911_p1 = scmp.eq.s32.totalorder %s722_s16, 0 }
   0x8   : > { %p112_p3 = scmp.eq.s32.totalorder %s390_s17, 1  ;;  %p391_p5 = scmp.ge.s32.totalorder %s671_s15, 1 }
   0x9   : > { %p731_p4 = por %p911_p1, %p40_p0  ;;  %p119_p7 = scmp.lt.s32.totalorder %s671_s15, 3 }
   0xa   : > { %p736_p6 = por %p112_p3, %p40_p0  ;;  %s673_s21 = smov [#allocation5]  }
   0xb   : > { %s914_s18 = scalar_select %p731_p4, 1, 0 }
   0xc   : > { %s915_s19 = scalar_select %p736_p6, 1, 0 }
   0xd   : > { %p741_p8 = pnand %p391_p5, %p119_p7  ;;  %s131_s22 = sshll.u32 %s673_s21, 4  ;;  %s745_s22 = int_to_ptr.vmem [resolvable:$true] %s131_s22 }
   0xe   : > { %s757_s24 = sadd.s32 1, %s671_s15   ;;  %s27_s25 = sadd.s32 1, %s667_s14 }
   0xf   : > { %s916_s20 = scalar_select %p741_p8, 1, 0 }
  0x10   : > { %p489_p9 = pneg %p741_p8  ;;  %s24_s26 = ssub.s32 %s671_s15, %s757_s24 }
  0x11   : > { %s543_s29 = scalar_lea.hbm %s908_s1, 2048 }
  0x12   : > { %p752_p11 = pnand %p489_p9, %p911_p1  ;;  %p544_p12 = scmp.ne.s32.totalorder %s908_s1, %s543_s29 }
  0x13   : > { %p550_p5 = scmp.lt.u32.totalorder %s543_s29, %s908_s1 }
  0x14   : > { %p545_p13 = pneg %p752_p11 }
  0x16   : > { %p546_p0 = pnand %p545_p13, %p544_p12 }
  0x18   : > { %p547_p3 = pneg %p546_p0 }
  0x1a   : > { %p552_p7 = pnand %p550_p5, %p547_p3 }
  0x1c   : > { %555 = shalt.err (!%p552_p7)
}
  0x1d   : > { %s556_s7 = scalar_lea.vmem %s745_s22, 2048  ;;  %p564_p2 = scmp.lt.s32.totalorder %s745_s22, %s745_s22 }
  0x1e   : > { %p557_p9 = scmp.ne.s32.totalorder %s745_s22, %s556_s7  ;;  %p565_p6 = scmp.lt.s32.totalorder %s556_s7, %s556_s7 }
  0x20   : > { %p559_p10 = pnand %p557_p9, %p545_p13  ;;  %p566_p4 = por %p565_p6, %p564_p2 }
  0x22   : > { %p560_p1 = pneg %p559_p10 }
  0x24   : > { %p567_p8 = pnand %p566_p4, %p560_p1 }
  0x26   : > { %570 = shalt.err (!%p567_p8)
}
  0x27   : > { %s674_s8 = smov 128   ;;  %s675_s9 = smov 8  }
  0x28   : > { %492 = dma.hbm_to_vmem [thread:$0]  (!%p752_p11), %s908_s1, 2048, %s745_s22, [#allocation6], %s674_s8, %s674_s8, %s675_s9  }
  0x29   : > { %p25_p2 = scmp.eq.s32.totalorder %s24_s26, 0  ;;  %p34_p1 = scmp.ne.s32.totalorder %s667_s14, %s663_s13 }
  0x2a   : > { %p35_p4 = scmp.eq.s32.totalorder %s671_s15, 0  ;;  %p502_p6 = scmp.lt.s32.totalorder %s671_s15, 2 }
  0x2b   : > { %s788_s17 = scalar_select %p25_p2, %s667_s14, %s27_s25  }
  0x2c   : > { %p36_p8 = por %p35_p4, %p34_p1  ;;  %p918_p10 = scmp.eq.s32.totalorder %s722_s16, 1 }
  0x2d   : > { %s148_s27 = sand.u32 1, %s667_s14   ;;  %s395_s28 = sshll.u32 %s671_s15, 7 }
  0x2e   : > { %p792_p12 = por %p918_p10, %p34_p1  ;;  %s394_s29 = sshll.u32 %s148_s27, 3 }
  0x2f   : > { %s801_s4 = scalar_lea.hbm %s907_s0, %s395_s28  ;;  %s152_s22 = scalar_lea.vmem [#allocation2], %s394_s29 }
  0x30   : > { %s159_s25 = sshll.u32 %s152_s22, 4  ;;  %p803_p11 = pnand %p502_p6, %p36_p8  ;;  %s807_s25 = int_to_ptr.vmem [resolvable:$true] %s159_s25 }
  0x31   : > { %s149_s5 = scalar_lea.sflag [#allocation3], %s148_s27  ;;  %s571_s6 = scalar_lea.hbm %s801_s4, 128 }
  0x32   : > { %p572_p13 = scmp.ne.s32.totalorder %s801_s4, %s571_s6  ;;  %p573_p0 = pneg %p803_p11 }
  0x33   : > { %s576_s9 = scalar_lea.hbm %s907_s0, 256  ;;  %p577_p7 = scmp.lt.u32.totalorder %s801_s4, %s907_s0 }
  0x34   : > { %p574_p3 = pnand %p573_p0, %p572_p13  ;;  %p578_p9 = scmp.lt.u32.totalorder %s576_s9, %s571_s6 }
  0x35   : > { %p580_p1 = scmp.lt.u32.totalorder %s571_s6, %s801_s4 }
  0x36   : > { %p575_p5 = pneg %p574_p3  ;;  %p579_p2 = por %p578_p9, %p577_p7 }
  0x38   : > { %p581_p4 = por %p580_p1, %p579_p2 }
  0x3a   : > { %p582_p6 = pnand %p581_p4, %p575_p5 }
  0x3c   : > { %585 = shalt.err (!%p582_p6)
}
  0x3d   : > { %s586_s27 = scalar_lea.vmem %s807_s25, 128  ;;  %s676_s28 = smov [#allocation2]  }
  0x3e   : > { %p587_p8 = scmp.ne.s32.totalorder %s807_s25, %s586_s27  ;;  %s591_s29 = sshll.u32 %s676_s28, 4  ;;  %s592_s29 = int_to_ptr.vmem [resolvable:$false] %s591_s29 }
  0x3f   : > { %s593_s23 = scalar_lea.vmem %s592_s29, 256  ;;  %p594_p3 = scmp.lt.s32.totalorder %s807_s25, %s592_s29 }
  0x40   : > { %p589_p10 = pnand %p587_p8, %p573_p0  ;;  %p595_p7 = scmp.lt.s32.totalorder %s593_s23, %s586_s27 }
  0x42   : > { %p590_p13 = pneg %p589_p10  ;;  %p596_p9 = por %p595_p7, %p594_p3 }
  0x44   : > { %p597_p2 = pnand %p596_p9, %p590_p13 }
  0x46   : > { %600 = shalt.err (!%p597_p2)
}
  0x47   : > { %496 = dma.hbm_to_vmem [thread:$0]  (!%p803_p11), %s801_s4, 128, %s807_s25, %s149_s5  }
  0x48   : > { %p921_p5 = scmp.ne.s32.totalorder %s916_s20, 0 }
  0x49   : > { %s837_s30 = sand.u32 (!%p921_p5), 1, %s663_s13   ;;  %p922_p0 = scmp.ne.s32.totalorder (!%p921_p5), %s914_s18, 0 }
  0x4a   : > { %168 = sbr.rel (%p921_p5) target bundleno = 347 (0x15b), region = 32  ;;  %s397_s22 = sshll.u32 (!%p921_p5), %s837_s30, 3 }
  0x4b   : > { %s171_s6 = scalar_lea.sflag (!%p921_p5), [#allocation3], %s837_s30  ;;  %s843_s7 = scalar_lea.vmem (!%p921_p5), [#allocation2], %s397_s22 }
  0x51   : > { %646 = dma.done.wait (%p922_p0), %s171_s6, 128  }
  0x52   : > { %648 = vsyncadd (%p922_p0), %s171_s6, 4294967168  ;;  %p923_p11 = scmp.eq.s32.totalorder %s722_s16, 0 }
  0x54   : > { %650 = dma.done.wait (%p923_p11), [#allocation6], 2048   ;;  %p924_p1 = pmov %p923_p11 }
  0x55   : > { %v677_v0 = vmov 0.0|0.0   ;;  %vm678_vm0 = vmmov 0   ;;  %v679_v1 = vmov 0.0   ;;  %v202_v2 = vld [vmem:[#allocation5] sm:$0xff]  ;;  %v203_v3 = vld [vmem:[#allocation5 + $0x8] sm:$0xff]  ;;  %v204_v4 = vld [vmem:[#allocation5 + $0x10] sm:$0xff] }
  0x56   : > { %652 = vsyncadd (%p924_p1), [#allocation6], 4294965248  ;;  %457 = vmatprep.subr.bf16.mxu0 %v677_v0  ;;  %454 = vmatprep.mubr.msk.f32.mxu0 %vm678_vm0, %v679_v1  ;;  %v458_v5 = vpack.c.bf16 %v203_v3, %v202_v2  ;;  %v205_v6 = vld [vmem:[#allocation5 + $0x18] sm:$0xff]  ;;  %v206_v8 = vld [vmem:[#allocation5 + $0x20] sm:$0xff]  ;;  %s402_s4 = sshll.u32 %s722_s16, 7  ;;  %s200_s25 = scalar_lea.vmem [#allocation7], %s397_s22 }
  0x57   : > { %v461_v7 = vpack.c.bf16 %v205_v6, %v204_v4  ;;  %v207_v9 = vld [vmem:[#allocation5 + $0x28] sm:$0xff]  ;;  %v208_v11 = vld [vmem:[#allocation5 + $0x30] sm:$0xff]  ;;  %v209_v12 = vld [vmem:[#allocation5 + $0x38] sm:$0xff]  ;;  %s310_s26 = sshll.u32 %s200_s25, 4  ;;  %s863_s9 = scalar_lea.hbm %s910_s3, %s402_s4  ;;  %s865_s26 = int_to_ptr.vmem [resolvable:$true] %s310_s26 }
  0x58   : > { %459 = vmatpush3.bf16.msra.mxu0 %v458_v5  ;;  %v464_v10 = vpack.c.bf16 %v207_v9, %v206_v8  ;;  %v467_v13 = vpack.c.bf16 %v209_v12, %v208_v11  ;;  %v210_v14 = vld [vmem:[#allocation5 + $0x40] sm:$0xff]  ;;  %v211_v15 = vld [vmem:[#allocation5 + $0x48] sm:$0xff]  ;;  %v212_v17 = vld [vmem:[#allocation5 + $0x50] sm:$0xff]  ;;  %s297_s10 = scalar_lea.sflag [#allocation4], %s837_s30  ;;  %s601_s11 = scalar_lea.vmem %s865_s26, 128 }
  0x59   : > { %460 = vmatprep.subr.bf16.mxu0 %v677_v0  ;;  %v470_v16 = vpack.c.bf16 %v211_v15, %v210_v14  ;;  %v213_v18 = vld [vmem:[#allocation5 + $0x58] sm:$0xff]  ;;  %v214_v20 = vld [vmem:[#allocation5 + $0x60] sm:$0xff]  ;;  %v215_v21 = vld [vmem:[#allocation5 + $0x68] sm:$0xff]  ;;  %p602_p4 = scmp.ne.s32.totalorder %s865_s26, %s601_s11  ;;  %s680_s16 = smov [#allocation7]  }
  0x5a   : > { %v473_v19 = vpack.c.bf16 %v213_v18, %v212_v17  ;;  %v476_v22 = vpack.c.bf16 %v215_v21, %v214_v20  ;;  %v216_v23 = vld [vmem:[#allocation5 + $0x70] sm:$0xff]  ;;  %v217_v24 = vld [vmem:[#allocation5 + $0x78] sm:$0xff]  ;;  %s605_s27 = sshll.u32 %s680_s16, 4  ;;  %s606_s27 = int_to_ptr.vmem [resolvable:$false] %s605_s27 }
  0x5b   : > { %v479_v25 = vpack.c.bf16 %v217_v24, %v216_v23  ;;  %v201_v26 = vld [vmem:[%s843_s7] sm:$0xff]  ;;  %p603_p6 = pnand %p602_p4, %p792_p12  ;;  %s607_s28 = scalar_lea.vmem %s606_s27, 256 }
  0x5c   : > { %462 = vmatpush3.bf16.msra.mxu0 %v461_v7  ;;  %v400_v27 = vld [vmem:[%s909_s2] ss:$0 sm:$0xff]  ;;  %p608_p10 = scmp.lt.s32.totalorder %s865_s26, %s606_s27  ;;  %p609_p13 = scmp.lt.s32.totalorder %s607_s28, %s601_s11 }
  0x5d   : > { %463 = vmatprep.subr.bf16.mxu0 %v677_v0  ;;  %p604_p8 = pneg %p603_p6 }
  0x5e   : > { %p610_p3 = por %p609_p13, %p608_p10 }
  0x60   : > { %465 = vmatpush3.bf16.msra.mxu0 %v464_v10  ;;  %p611_p7 = pnand %p610_p3, %p604_p8 }
  0x61   : > { %466 = vmatprep.subr.bf16.mxu0 %v677_v0 }
  0x64   : > { %468 = vmatpush3.bf16.msra.mxu0 %v467_v13 }
  0x65   : > { %469 = vmatprep.subr.bf16.mxu0 %v677_v0 }
  0x68   : > { %471 = vmatpush3.bf16.msra.mxu0 %v470_v16 }
  0x69   : > { %472 = vmatprep.subr.bf16.mxu0 %v677_v0 }
  0x6c   : > { %474 = vmatpush3.bf16.msra.mxu0 %v473_v19 }
  0x6d   : > { %475 = vmatprep.subr.bf16.mxu0 %v677_v0 }
  0x70   : > { %477 = vmatpush3.bf16.msra.mxu0 %v476_v22 }
  0x71   : > { %478 = vmatprep.subr.bf16.mxu0 %v677_v0 }
  0x74   : > { %480 = vmatpush3.bf16.msra.mxu0 %v479_v25 }
  0x77   : > { %455 = vmatmul.mubr.f32.vlgmr.msra.gmra.mrb[0].mxu0 %v201_v26 }
 0x14a   : > { %v291_v28 = vpop.f32.mrb[0].mxu0 }
 0x14b   : > { %v292_v29 = vadd.f32 %v400_v27, %v291_v28  ;;  %v456_v30 = vpop.f32.mrb[1].mxu0 }
 0x14d   : > { %295 = vst [vmem:[%s200_s25] sm:$0xff] %v292_v29 }
 0x14e   : > { %614 = shalt.err (!%p611_p7)
}
 0x14f   : > { %s615_s29 = scalar_lea.hbm %s863_s9, 128  ;;  %s619_s22 = scalar_lea.hbm %s910_s3, 256 }
 0x150   : > { %p616_p9 = scmp.ne.s32.totalorder %s863_s9, %s615_s29  ;;  %p620_p0 = scmp.lt.u32.totalorder %s863_s9, %s910_s3 }
 0x151   : > { %p621_p11 = scmp.lt.u32.totalorder %s619_s22, %s615_s29  ;;  %p623_p4 = scmp.lt.u32.totalorder %s615_s29, %s863_s9 }
 0x152   : > { %p617_p2 = pnand %p616_p9, %p792_p12 }
 0x153   : > { %p622_p1 = por %p621_p11, %p620_p0 }
 0x154   : > { %p618_p5 = pneg %p617_p2 }
 0x155   : > { %p624_p6 = por %p623_p4, %p622_p1 }
 0x157   : > { %p625_p8 = pnand %p624_p6, %p618_p5 }
 0x159   : > { %628 = shalt.err (!%p625_p8)
}
 0x15a   : > { %487 = dma.vmem_to_hbm [thread:$0]  (%p792_p12), %s865_s26, 128, %s863_s9, %s297_s10  }
 0x15b PF: > { %s322_s18 = sand.u32 1, %s659_s12   ;;  %p925_p10 = scmp.ne.s32.totalorder %s915_s19, 0 }
 0x15c   : > { %p926_p13 = scmp.ge.s32.totalorder %s671_s15, 2  ;;  %s323_s20 = scalar_lea.sflag [#allocation4], %s322_s18 }
 0x15e   : > { %p498_p3 = pnand %p926_p13, %p925_p10 }
 0x160   : > { %654 = dma.done.wait (!%p498_p3), %s323_s20, 128  }
 0x161   : > { %656 = vsyncadd (!%p498_p3), %s323_s20, 4294967168  ;;  %p17_p7 = scmp.ge.s32.totalorder %s757_s24, 4   ;;  %s927_s12 = smov %s663_s13 }
 0x162   : > { %s928_s13 = smov %s667_s14  ;;  %s929_s14 = smov %s788_s17 }
 0x163   : > { %s930_s15 = smov %s757_s24  ;;  %19 = sbr.rel (!%p17_p7) target bundleno = 6 (0x6), region = 81 }
 0x16a   :  { %328 = vsyncpa [#allocation3], 1 }
 0x16b   :  { %330 = vsyncpa [#allocation3 + $0x1], 1 }
 0x16c   :  { %331 = vsyncpa [#allocation6], 1 }
 0x16d   :  { %332 = vsyncpa [#allocation4], 1 }
 0x16e   :  { %334 = vsyncpa [#allocation4 + $0x1], 1 }

</bundles_post_ra>
